<compile_context>
chip_gen: v5e
topology: v5e:2x2
jax: 0.10.0
libtpu: 0.0.40
codegen_flags: <defaults>
</compile_context>

<pallas_src>
import functools

import jax
import jax.numpy as jnp
from jax.experimental import pallas as pl
from jax.experimental.pallas import tpu as pltpu

_LAPLACIAN = ((-1.0, -1.0, -1.0),
              (-1.0,  8.0, -1.0),
              (-1.0, -1.0, -1.0))


def _detail_loss_kernel(mask_ref, logit_ref, out_ref, scr_ref, *,
                        H, W, thr, fuse_w, simplify):
    """Per-batch-element kernel.

    mask_ref  : (1, H, W)          f32  raw gt mask (no HBM padding)
    logit_ref : (1, H, W)          f32  boundary logits
    out_ref   : (1, 8, 128)        f32  rows 0..3 carry
                                        [bce_sum, inter, sig_sum, tgt_sum]
    scr_ref   : (H+16, W+256)      f32  zero-bordered scratch; the image
                                        interior lives at the (8,128)-aligned
                                        offset so interior stores are aligned
                                        and only shifted loads are unaligned.
    """
    PR, PC = 8, 128                       # aligned interior offset

    m = mask_ref[0]                       # (H, W)
    z = logit_ref[0]                      # (H, W)

    # --- zero the scratch so out-of-image reads act as zero padding ---------
    scr_ref[...] = jnp.zeros_like(scr_ref)
    scr_ref[PR:PR + H, PC:PC + W] = m     # aligned interior store

    # --- separable 3x3 box sum with zero padding ----------------------------
    h = (scr_ref[PR:PR + H, PC - 1:PC - 1 + W] + m
         + scr_ref[PR:PR + H, PC + 1:PC + 1 + W])             # row 3-tap
    scr_ref[PR:PR + H, PC:PC + W] = h
    box = (scr_ref[PR - 1:PR - 1 + H, PC:PC + W] + h
           + scr_ref[PR + 1:PR + 1 + H, PC:PC + W])           # col 3-tap

    # Laplacian (pad=1) == 9*m - box3x3(m);  clamp(min=0)
    c = jnp.maximum(9.0 * m - box, 0.0)

    # --- strided conv + nearest upsample == block replication ---------------
    #   r_s[y, x] = c[y - y % s, x - x % s]
    scr_ref[PR:PR + H, PC:PC + W] = c
    c_l = scr_ref[PR:PR + H, PC - 1:PC - 1 + W]       # c[y,   x-1]
    c_u = scr_ref[PR - 1:PR - 1 + H, PC:PC + W]       # c[y-1, x  ]
    c_ul = scr_ref[PR - 1:PR - 1 + H, PC - 1:PC - 1 + W]
    row = jax.lax.broadcasted_iota(jnp.int32, (H, W), 0)
    col = jax.lax.broadcasted_iota(jnp.int32, (H, W), 1)
    ye1 = (row & 1) == 0
    xe1 = (col & 1) == 0
    r2 = jnp.where(ye1, jnp.where(xe1, c, c_l), jnp.where(xe1, c_u, c_ul))

    if simplify:
        # Default fuse weights/threshold: fused target == (bt1 OR bt2); the
        # x4 branch never influences the output, skip it entirely.
        tgt = (jnp.maximum(c, r2) > thr).astype(jnp.float32)
    else:
        # General path: build r4 from r2 the same way (shift by 2, parity & 2).
        scr_ref[PR:PR + H, PC:PC + W] = r2
        r_l = scr_ref[PR:PR + H, PC - 2:PC - 2 + W]
        r_u = scr_ref[PR - 2:PR - 2 + H, PC:PC + W]
        r_ul = scr_ref[PR - 2:PR - 2 + H, PC - 2:PC - 2 + W]
        ye2 = (row & 2) == 0
        xe2 = (col & 2) == 0
        r4 = jnp.where(ye2, jnp.where(xe2, r2, r_l),
                       jnp.where(xe2, r_u, r_ul))
        bt1 = (c > thr).astype(jnp.float32)
        bt2 = (r2 > thr).astype(jnp.float32)
        bt4 = (r4 > thr).astype(jnp.float32)
        fused = fuse_w[0] * bt1 + fuse_w[1] * bt2 + fuse_w[2] * bt4
        tgt = (fused > thr).astype(jnp.float32)
    # NOTE: the x8 branch in the PyTorch module is computed but never used.

    # --- BCE-with-logits map + sigmoid, sharing e = exp(-|z|) ----------------
    e = jnp.exp(-jnp.abs(z))
    one_p_e = 1.0 + e
    bce_map = jnp.maximum(z, 0.0) - z * tgt + jnp.log(one_p_e)
    sig = jnp.where(z >= 0.0, 1.0, e) / one_p_e

    bce_sum = jnp.sum(bce_map)
    inter = jnp.sum(sig * tgt)
    sig_sum = jnp.sum(sig)
    tgt_sum = jnp.sum(tgt)

    rid = jax.lax.broadcasted_iota(jnp.int32, (8, 128), 0)
    out_ref[0] = ((rid == 0).astype(jnp.float32) * bce_sum
                  + (rid == 1).astype(jnp.float32) * inter
                  + (rid == 2).astype(jnp.float32) * sig_sum
                  + (rid == 3).astype(jnp.float32) * tgt_sum)


def detail_aggregate_loss(boundary_logits, gtmasks, *,
                          loss_weight=1.0, bce_loss_weight=1.0,
                          dice_loss_weight=1.0, boundary_threshold=0.1,
                          fuse_kernel=(0.6, 0.3, 0.1)):
    N, C, H, W = boundary_logits.shape
    assert C == 1 and gtmasks.shape == (N, H, W)
    assert H % 4 == 0 and W % 4 == 0, "spatial size must be divisible by 4"

    masks = gtmasks.astype(jnp.float32)
    logits = boundary_logits.astype(jnp.float32).reshape(N, H, W)

    w0, w1, w2 = (float(v) for v in fuse_kernel)
    thr = float(boundary_threshold)
    # Compile-time check: with non-negative weights, w0 > thr, w1 > thr and
    # w2 <= thr the fused binary target is exactly (bt1 OR bt2).
    simplify = (thr >= 0.0 and min(w0, w1, w2) >= 0.0
                and w0 > thr and w1 > thr and w2 <= thr)

    kern = functools.partial(_detail_loss_kernel, H=H, W=W, thr=thr,
                             fuse_w=(w0, w1, w2), simplify=simplify)

    cost = pl.CostEstimate(
        flops=int(N) * H * W * 40,
        transcendentals=int(N) * H * W * 2,
        bytes_accessed=4 * (2 * N * H * W + N * 8 * 128))

    vmem_est = 4 * (4 * H * W + (H + 16) * (W + 256) + 2 * 8 * 128) + (4 << 20)
    vmem_limit = int(max(8 << 20, min(vmem_est, 48 << 20)))

    parts = pl.pallas_call(
        kern,
        out_shape=jax.ShapeDtypeStruct((N, 8, 128), jnp.float32),
        grid=(N,),
        in_specs=[
            pl.BlockSpec((1, H, W), lambda b: (b, 0, 0)),
            pl.BlockSpec((1, H, W), lambda b: (b, 0, 0)),
        ],
        out_specs=pl.BlockSpec((1, 8, 128), lambda b: (b, 0, 0)),
        scratch_shapes=[pltpu.VMEM((H + 16, W + 256), jnp.float32)],
        compiler_params=pltpu.CompilerParams(
            dimension_semantics=("parallel",),
            vmem_limit_bytes=vmem_limit),
        cost_estimate=cost,
    )(masks, logits)

    bce_sum = parts[:, 0, 0]
    inter = parts[:, 1, 0]
    sig_sum = parts[:, 2, 0]
    tgt_sum = parts[:, 3, 0]

    bce = jnp.sum(bce_sum) / (N * H * W)   # F.binary_cross_entropy_with_logits (mean)
    smooth = 1.0
    dice = jnp.mean(1.0 - (2.0 * inter + smooth) / (sig_sum + tgt_sum + smooth))
    return loss_weight * (bce_loss_weight * bce + dice_loss_weight * dice)


def _reference(boundary_logits, gtmasks, thr=0.1, fuse_w=(0.6, 0.3, 0.1)):
    """Plain-JAX reference mirroring the PyTorch forward semantics."""
    N, H, W = gtmasks.shape
    pad = jnp.pad(gtmasks.astype(jnp.float32), ((0, 0), (1, 1), (1, 1)))
    conv = jnp.zeros((N, H, W), jnp.float32)
    for di in range(3):
        for dj in range(3):
            conv = conv + _LAPLACIAN[di][dj] * pad[:, di:di + H, dj:dj + W]
    c = jnp.maximum(conv, 0.0)
    bt1 = (c > thr).astype(jnp.float32)

    def up(s):
        small = c[:, ::s, ::s]                      # == strided conv (pad=1)
        return jnp.repeat(jnp.repeat(small, s, axis=1), s, axis=2)

    bt2 = (up(2) > thr).astype(jnp.float32)
    bt4 = (up(4) > thr).astype(jnp.float32)
    fused = fuse_w[0] * bt1 + fuse_w[1] * bt2 + fuse_w[2] * bt4
    tgt = (fused > thr).astype(jnp.float32)

    z = boundary_logits[:, 0].astype(jnp.float32)
    bce = jnp.mean(jnp.maximum(z, 0.0) - z * tgt + jnp.log1p(jnp.exp(-jnp.abs(z))))
    sig = jax.nn.sigmoid(z)
    inter = jnp.sum(sig * tgt, axis=(1, 2))
    isum = jnp.sum(sig, axis=(1, 2))
    tsum = jnp.sum(tgt, axis=(1, 2))
    dice = jnp.mean(1.0 - (2.0 * inter + 1.0) / (isum + tsum + 1.0))
    return 1.0 * (1.0 * bce + 1.0 * dice)


if __name__ == "__main__":
    key = jax.random.PRNGKey(0)
    k1, k2 = jax.random.split(key)
    N, H, W = 2, 16, 16
    gtmasks = (jax.random.uniform(k1, (N, H, W)) > 0.5).astype(jnp.float32)
    boundary_logits = jax.random.normal(k2, (N, 1, H, W), dtype=jnp.float32)

    # Default params -> simplified fast path (tgt == bt1 | bt2).
    loss = jax.block_until_ready(detail_aggregate_loss(boundary_logits, gtmasks))
    ref = _reference(boundary_logits, gtmasks)
    assert jnp.allclose(loss, ref, rtol=2e-4, atol=1e-5), (loss, ref)

    # Non-default threshold -> exercises the general (x4 + fuse) path.
    loss2 = jax.block_until_ready(
        detail_aggregate_loss(boundary_logits, gtmasks, boundary_threshold=0.35))
    ref2 = _reference(boundary_logits, gtmasks, thr=0.35)
    assert jnp.allclose(loss2, ref2, rtol=2e-4, atol=1e-5), (loss2, ref2)

    print("KERNEL_OK")
</pallas_src>

<mosaic_0001>
module attributes {stable_mosaic.version = 11 : i64} {
  func.func @_detail_loss_kernel(%arg0: i32, %arg1: memref<1x16x16xf32, #tpu.memory_space<vmem>>, %arg2: memref<1x16x16xf32, #tpu.memory_space<vmem>>, %arg3: memref<1x8x128xf32, #tpu.memory_space<vmem>>, %arg4: memref<32x272xf32, #tpu.memory_space<vmem>>) attributes {dimension_semantics = [#tpu.dimension_semantics<parallel>], iteration_bounds = array<i64: 2>, scalar_prefetch = 0 : i64, scratch_operands = 1 : i64, tpu.core_type = #tpu.core_type<tc>, window_params = [{transform_indices = @transform_0, window_bounds = array<i64: 1, 16, 16>}, {transform_indices = @transform_1, window_bounds = array<i64: 1, 16, 16>}, {transform_indices = @transform_2, window_bounds = array<i64: 1, 8, 128>}]} {
    %c0 = arith.constant 0 : index
    %c0_0 = arith.constant 0 : index
    %c0_1 = arith.constant 0 : index
    %0 = vector.load %arg1[%c0, %c0_0, %c0_1] : memref<1x16x16xf32, #tpu.memory_space<vmem>>, vector<1x16x16xf32>
    %1 = vector.shape_cast %0 : vector<1x16x16xf32> to vector<16x16xf32>
    %c0_2 = arith.constant 0 : index
    %c0_3 = arith.constant 0 : index
    %c0_4 = arith.constant 0 : index
    %2 = vector.load %arg2[%c0_2, %c0_3, %c0_4] : memref<1x16x16xf32, #tpu.memory_space<vmem>>, vector<1x16x16xf32>
    %3 = vector.shape_cast %2 : vector<1x16x16xf32> to vector<16x16xf32>
    %cst = arith.constant 0.000000e+00 : f32
    %4 = vector.broadcast %cst : f32 to vector<32x272xf32>
    %c0_5 = arith.constant 0 : index
    %c0_6 = arith.constant 0 : index
    %5 = vector.load %arg4[%c0_5, %c0_6] : memref<32x272xf32, #tpu.memory_space<vmem>>, vector<32x272xf32>
    tpu.vector_store %arg4[%c0_5, %c0_6], %4 {strides = array<i32>} : memref<32x272xf32, #tpu.memory_space<vmem>>, vector<32x272xf32>,
    %c8 = arith.constant 8 : index
    %c128 = arith.constant 128 : index
    %6 = vector.load %arg4[%c8, %c128] : memref<32x272xf32, #tpu.memory_space<vmem>>, vector<16x16xf32>
    tpu.vector_store %arg4[%c8, %c128], %1 {strides = array<i32>} : memref<32x272xf32, #tpu.memory_space<vmem>>, vector<16x16xf32>,
    %c8_7 = arith.constant 8 : index
    %c127 = arith.constant 127 : index
    %7 = vector.load %arg4[%c8_7, %c127] : memref<32x272xf32, #tpu.memory_space<vmem>>, vector<16x16xf32>
    %8 = arith.addf %7, %1 : vector<16x16xf32>
    %c8_8 = arith.constant 8 : index
    %c129 = arith.constant 129 : index
    %9 = vector.load %arg4[%c8_8, %c129] : memref<32x272xf32, #tpu.memory_space<vmem>>, vector<16x16xf32>
    %10 = arith.addf %8, %9 : vector<16x16xf32>
    %c8_9 = arith.constant 8 : index
    %c128_10 = arith.constant 128 : index
    %11 = vector.load %arg4[%c8_9, %c128_10] : memref<32x272xf32, #tpu.memory_space<vmem>>, vector<16x16xf32>
    tpu.vector_store %arg4[%c8_9, %c128_10], %10 {strides = array<i32>} : memref<32x272xf32, #tpu.memory_space<vmem>>, vector<16x16xf32>,
    %c7 = arith.constant 7 : index
    %c128_11 = arith.constant 128 : index
    %12 = vector.load %arg4[%c7, %c128_11] : memref<32x272xf32, #tpu.memory_space<vmem>>, vector<16x16xf32>
    %13 = arith.addf %12, %10 : vector<16x16xf32>
    %c9 = arith.constant 9 : index
    %c128_12 = arith.constant 128 : index
    %14 = vector.load %arg4[%c9, %c128_12] : memref<32x272xf32, #tpu.memory_space<vmem>>, vector<16x16xf32>
    %15 = arith.addf %13, %14 : vector<16x16xf32>
    %cst_13 = arith.constant 9.000000e+00 : f32
    %16 = vector.broadcast %cst_13 : f32 to vector<16x16xf32>
    %17 = arith.mulf %16, %1 : vector<16x16xf32>
    %18 = arith.subf %17, %15 : vector<16x16xf32>
    %cst_14 = arith.constant 0.000000e+00 : f32
    %19 = vector.broadcast %cst_14 : f32 to vector<16x16xf32>
    %20 = arith.maximumf %18, %19 : vector<16x16xf32>
    %c8_15 = arith.constant 8 : index
    %c128_16 = arith.constant 128 : index
    %21 = vector.load %arg4[%c8_15, %c128_16] : memref<32x272xf32, #tpu.memory_space<vmem>>, vector<16x16xf32>
    tpu.vector_store %arg4[%c8_15, %c128_16], %20 {strides = array<i32>} : memref<32x272xf32, #tpu.memory_space<vmem>>, vector<16x16xf32>,
    %c8_17 = arith.constant 8 : index
    %c127_18 = arith.constant 127 : index
    %22 = vector.load %arg4[%c8_17, %c127_18] : memref<32x272xf32, #tpu.memory_space<vmem>>, vector<16x16xf32>
    %c7_19 = arith.constant 7 : index
    %c128_20 = arith.constant 128 : index
    %23 = vector.load %arg4[%c7_19, %c128_20] : memref<32x272xf32, #tpu.memory_space<vmem>>, vector<16x16xf32>
    %c7_21 = arith.constant 7 : index
    %c127_22 = arith.constant 127 : index
    %24 = vector.load %arg4[%c7_21, %c127_22] : memref<32x272xf32, #tpu.memory_space<vmem>>, vector<16x16xf32>
    %25 = tpu.iota {dimensions = array<i32: 0>} : vector<16x16xi32>
    %26 = tpu.iota {dimensions = array<i32: 1>} : vector<16x16xi32>
    %c1_i32 = arith.constant 1 : i32
    %27 = vector.broadcast %c1_i32 : i32 to vector<16x16xi32>
    %28 = arith.andi %25, %27 : vector<16x16xi32>
    %c0_i32 = arith.constant 0 : i32
    %29 = vector.broadcast %c0_i32 : i32 to vector<16x16xi32>
    %30 = arith.cmpi eq, %28, %29 : vector<16x16xi32>
    %c1_i32_23 = arith.constant 1 : i32
    %31 = vector.broadcast %c1_i32_23 : i32 to vector<16x16xi32>
    %32 = arith.andi %26, %31 : vector<16x16xi32>
    %c0_i32_24 = arith.constant 0 : i32
    %33 = vector.broadcast %c0_i32_24 : i32 to vector<16x16xi32>
    %34 = arith.cmpi eq, %32, %33 : vector<16x16xi32>
    %35 = arith.select %34, %20, %22 : vector<16x16xi1>, vector<16x16xf32>
    %36 = arith.select %34, %23, %24 : vector<16x16xi1>, vector<16x16xf32>
    %37 = arith.select %30, %35, %36 : vector<16x16xi1>, vector<16x16xf32>
    %38 = arith.maximumf %20, %37 : vector<16x16xf32>
    %cst_25 = arith.constant 1.000000e-01 : f32
    %39 = vector.broadcast %cst_25 : f32 to vector<16x16xf32>
    %40 = arith.cmpf ogt, %38, %39 : vector<16x16xf32>
    %41 = arith.extui %40 : vector<16x16xi1> to vector<16x16xi32>
    %42 = arith.sitofp %41 : vector<16x16xi32> to vector<16x16xf32>
    %43 = math.absf %3 : vector<16x16xf32>
    %cst_26 = arith.constant 0.000000e+00 : f32
    %44 = vector.broadcast %cst_26 : f32 to vector<16x16xf32>
    %45 = arith.subf %44, %43 : vector<16x16xf32>
    %46 = math.exp %45 : vector<16x16xf32>
    %cst_27 = arith.constant 1.000000e+00 : f32
    %47 = vector.broadcast %cst_27 : f32 to vector<16x16xf32>
    %48 = arith.addf %47, %46 : vector<16x16xf32>
    %cst_28 = arith.constant 0.000000e+00 : f32
    %49 = vector.broadcast %cst_28 : f32 to vector<16x16xf32>
    %50 = arith.maximumf %3, %49 : vector<16x16xf32>
    %51 = arith.mulf %3, %42 : vector<16x16xf32>
    %52 = arith.subf %50, %51 : vector<16x16xf32>
    %53 = math.log %48 : vector<16x16xf32>
    %54 = arith.addf %52, %53 : vector<16x16xf32>
    %cst_29 = arith.constant 0.000000e+00 : f32
    %55 = vector.broadcast %cst_29 : f32 to vector<16x16xf32>
    %56 = arith.cmpf oge, %3, %55 : vector<16x16xf32>
    %cst_30 = arith.constant 1.000000e+00 : f32
    %57 = vector.broadcast %cst_30 : f32 to vector<16x16xf32>
    %58 = arith.select %56, %57, %46 : vector<16x16xi1>, vector<16x16xf32>
    %59 = arith.divf %58, %48 : vector<16x16xf32>
    %60 = vector.shape_cast %54 : vector<16x16xf32> to vector<1x16x16xf32>
    %cst_31 = arith.constant dense<0.000000e+00> : vector<1xf32>
    %61 = vector.multi_reduction <add>, %60, %cst_31 [1, 2] : vector<1x16x16xf32> to vector<1xf32>
    %62 = vector.shape_cast %61 : vector<1xf32> to vector<1x1x1xf32>
    %63 = vector.extract %62[0, 0, 0] : f32 from vector<1x1x1xf32>
    %64 = arith.mulf %59, %42 : vector<16x16xf32>
    %65 = vector.shape_cast %64 : vector<16x16xf32> to vector<1x16x16xf32>
    %cst_32 = arith.constant dense<0.000000e+00> : vector<1xf32>
    %66 = vector.multi_reduction <add>, %65, %cst_32 [1, 2] : vector<1x16x16xf32> to vector<1xf32>
    %67 = vector.shape_cast %66 : vector<1xf32> to vector<1x1x1xf32>
    %68 = vector.extract %67[0, 0, 0] : f32 from vector<1x1x1xf32>
    %69 = vector.shape_cast %59 : vector<16x16xf32> to vector<1x16x16xf32>
    %cst_33 = arith.constant dense<0.000000e+00> : vector<1xf32>
    %70 = vector.multi_reduction <add>, %69, %cst_33 [1, 2] : vector<1x16x16xf32> to vector<1xf32>
    %71 = vector.shape_cast %70 : vector<1xf32> to vector<1x1x1xf32>
    %72 = vector.extract %71[0, 0, 0] : f32 from vector<1x1x1xf32>
    %73 = vector.shape_cast %42 : vector<16x16xf32> to vector<1x16x16xf32>
    %cst_34 = arith.constant dense<0.000000e+00> : vector<1xf32>
    %74 = vector.multi_reduction <add>, %73, %cst_34 [1, 2] : vector<1x16x16xf32> to vector<1xf32>
    %75 = vector.shape_cast %74 : vector<1xf32> to vector<1x1x1xf32>
    %76 = vector.extract %75[0, 0, 0] : f32 from vector<1x1x1xf32>
    %77 = tpu.iota {dimensions = array<i32: 0>} : vector<8x128xi32>
    %c0_i32_35 = arith.constant 0 : i32
    %78 = vector.broadcast %c0_i32_35 : i32 to vector<8x128xi32>
    %79 = arith.cmpi eq, %77, %78 : vector<8x128xi32>
    %80 = arith.extui %79 : vector<8x128xi1> to vector<8x128xi32>
    %81 = arith.sitofp %80 : vector<8x128xi32> to vector<8x128xf32>
    %82 = vector.broadcast %63 : f32 to vector<8x128xf32>
    %83 = arith.mulf %81, %82 : vector<8x128xf32>
    %c1_i32_36 = arith.constant 1 : i32
    %84 = vector.broadcast %c1_i32_36 : i32 to vector<8x128xi32>
    %85 = arith.cmpi eq, %77, %84 : vector<8x128xi32>
    %86 = arith.extui %85 : vector<8x128xi1> to vector<8x128xi32>
    %87 = arith.sitofp %86 : vector<8x128xi32> to vector<8x128xf32>
    %88 = vector.broadcast %68 : f32 to vector<8x128xf32>
    %89 = arith.mulf %87, %88 : vector<8x128xf32>
    %90 = arith.addf %83, %89 : vector<8x128xf32>
    %c2_i32 = arith.constant 2 : i32
    %91 = vector.broadcast %c2_i32 : i32 to vector<8x128xi32>
    %92 = arith.cmpi eq, %77, %91 : vector<8x128xi32>
    %93 = arith.extui %92 : vector<8x128xi1> to vector<8x128xi32>
    %94 = arith.sitofp %93 : vector<8x128xi32> to vector<8x128xf32>
    %95 = vector.broadcast %72 : f32 to vector<8x128xf32>
    %96 = arith.mulf %94, %95 : vector<8x128xf32>
    %97 = arith.addf %90, %96 : vector<8x128xf32>
    %c3_i32 = arith.constant 3 : i32
    %98 = vector.broadcast %c3_i32 : i32 to vector<8x128xi32>
    %99 = arith.cmpi eq, %77, %98 : vector<8x128xi32>
    %100 = arith.extui %99 : vector<8x128xi1> to vector<8x128xi32>
    %101 = arith.sitofp %100 : vector<8x128xi32> to vector<8x128xf32>
    %102 = vector.broadcast %76 : f32 to vector<8x128xf32>
    %103 = arith.mulf %101, %102 : vector<8x128xf32>
    %104 = arith.addf %97, %103 : vector<8x128xf32>
    %c0_37 = arith.constant 0 : index
    %c0_38 = arith.constant 0 : index
    %c0_39 = arith.constant 0 : index
    %105 = vector.load %arg3[%c0_37, %c0_38, %c0_39] : memref<1x8x128xf32, #tpu.memory_space<vmem>>, vector<1x8x128xf32>
    %106 = vector.shape_cast %105 : vector<1x8x128xf32> to vector<8x128xf32>
    %107 = vector.shape_cast %104 : vector<8x128xf32> to vector<1x8x128xf32>
    tpu.vector_store %arg3[%c0_37, %c0_38, %c0_39], %107 {strides = array<i32>} : memref<1x8x128xf32, #tpu.memory_space<vmem>>, vector<1x8x128xf32>,
    return
  }
  func.func @transform_0(%arg0: i32) -> (i32, i32, i32) {
    %c0_i32 = arith.constant 0 : i32
    %c0_i32_0 = arith.constant 0 : i32
    %c0_i32_1 = arith.constant 0 : i32
    return %arg0, %c0_i32, %c0_i32_0 : i32, i32, i32
  }
  func.func @transform_1(%arg0: i32) -> (i32, i32, i32) {
    %c0_i32 = arith.constant 0 : i32
    %c0_i32_0 = arith.constant 0 : i32
    %c0_i32_1 = arith.constant 0 : i32
    return %arg0, %c0_i32, %c0_i32_0 : i32, i32, i32
  }
  func.func @transform_2(%arg0: i32) -> (i32, i32, i32) {
    %c0_i32 = arith.constant 0 : i32
    %c0_i32_0 = arith.constant 0 : i32
    %c0_i32_1 = arith.constant 0 : i32
    return %arg0, %c0_i32, %c0_i32_0 : i32, i32, i32
  }
}

</mosaic_0001>

<bundles_post_ra>
// kernel: tpu_custom_call.1
= control target key start
LH: loop header
LB: loop body
LE: loop exit
PB: predicated region body
PF: predicated region fallthrough
CT: control target
= control target key end

     0   :  { %7 = vsyncpa [#allocation4], 0  ;;  %s1226_s0 = inlined_call_operand.hbm [shape: f32[2,16,16], index: 0, kind: input, shape index: {}]   ;;  %s1227_s1 = inlined_call_operand.hbm [shape: f32[2,16,16], index: 1, kind: input, shape index: {}]   ;;  %s1228_s2 = inlined_call_operand.hbm [shape: f32[2,8,128], index: 2, kind: output, shape index: {}]  }
   0x1   :  { %9 = vsyncpa [#allocation4 + $0x1], 0 }
   0x2   :  { %10 = vsyncpa [#allocation7], 0 }
   0x3   :  { %12 = vsyncpa [#allocation7 + $0x1], 0 }
   0x4   :  { %13 = vsyncpa [#allocation5], 0 }
   0x5   :  { %15 = vsyncpa [#allocation5 + $0x1], 0  ;;  %s910_s9 = smov 0   ;;  %s912_s10 = smov 0  }
   0x6   :  { %s914_s11 = smov 0   ;;  %s916_s12 = smov 0  }
   0x7 LB: > { %s931_s13 = sadd.s32 4294967295, %s887_s12   ;;  %s655_s14 = sadd.s32 4294967294, %s887_s12   ;;  %s887_s12 = sphi %s916_s12, %s1241_s12   ;;  %s883_s11 = sphi %s914_s11, %s1240_s11   ;;  %s879_s10 = sphi %s912_s10, %s1239_s10   ;;  %s875_s9 = sphi %s910_s9, %s1238_s9  }
   0x8   : > { %s935_s15 = sadd.s32 1, %s887_s12   ;;  %s28_s16 = sadd.s32 1, %s883_s11 }
   0x9   : > { %s25_s17 = ssub.s32 %s887_s12, %s935_s15  ;;  %p35_p0 = scmp.ne.s32.totalorder %s883_s11, %s879_s10 }
   0xa   : > { %p26_p1 = scmp.eq.s32.totalorder %s25_s17, 0  ;;  %p36_p2 = scmp.eq.s32.totalorder %s887_s12, 0 }
   0xb   : > { %p41_p3 = scmp.ne.s32.totalorder %s879_s10, %s875_s9  ;;  %p42_p4 = scmp.eq.s32.totalorder %s931_s13, 0 }
   0xc   : > { %s947_s18 = scalar_select %p26_p1, %s883_s11, %s28_s16  }
   0xd   : > { %p949_p5 = por %p36_p2, %p35_p0  ;;  %p953_p6 = por %p42_p4, %p41_p3 }
   0xe   : > { %p91_p7 = scmp.eq.s32.totalorder %s931_s13, 1  ;;  %p97_p8 = scmp.eq.s32.totalorder %s655_s14, 1 }
   0xf   : > { %p705_p10 = scmp.lt.s32.totalorder %s887_s12, 2  ;;  %s969_s23 = sand.u32 1, %s883_s11  }
  0x10   : > { %p960_p11 = por %p91_p7, %p35_p0  ;;  %p964_p12 = por %p97_p8, %p41_p3 }
  0x11   : > { %s678_s24 = sshll.u32 %s887_s12, 4  ;;  %s658_s25 = sshll.u32 %s969_s23, 4 }
  0x12   : > { %s126_s28 = scalar_lea.hbm %s1226_s0, %s678_s24  ;;  %s121_s30 = scalar_lea.vmem [#allocation3], %s658_s25 }
  0x13   : > { %s127_s29 = sshll.u32 %s126_s28, 4  ;;  %s129_s3 = sshll.u32 %s121_s30, 4  ;;  %s128_s29 = int_to_ptr.hbm [resolvable:$true] %s127_s29  ;;  %s130_s3 = int_to_ptr.vmem [resolvable:$true] %s129_s3 }
  0x14   : > { %p982_p13 = pnand %p705_p10, %p949_p5  ;;  %p664_p0 = scmp.ge.s32.totalorder %s887_s12, 1 }
  0x15   : > { %p159_p1 = scmp.lt.s32.totalorder %s887_s12, 3  ;;  %s118_s5 = scalar_lea.sflag [#allocation4], %s969_s23 }
  0x16   : > { %s757_s6 = sshra.s32 %s128_s29, 4  ;;  %p761_p3 = pneg %p982_p13  ;;  %s758_s6 = int_to_ptr.hbm [resolvable:$true] %s757_s6 }
  0x17   : > { %s759_s7 = scalar_lea.hbm %s758_s6, 16  ;;  %s764_s16 = scalar_lea.hbm %s1226_s0, 32 }
  0x18   : > { %p760_p2 = scmp.ne.s32.totalorder %s758_s6, %s759_s7  ;;  %p765_p5 = scmp.lt.s32.totalorder %s758_s6, %s1226_s0 }
  0x19   : > { %p766_p8 = scmp.lt.s32.totalorder %s764_s16, %s759_s7 }
  0x1a   : > { %p762_p4 = pnand %p761_p3, %p760_p2 }
  0x1b   : > { %p767_p10 = por %p766_p8, %p765_p5 }
  0x1c   : > { %p763_p7 = pneg %p762_p4 }
  0x1e   : > { %p768_p9 = pnand %p767_p10, %p763_p7 }
  0x20   : > { %771 = shalt.err (!%p768_p9)
}
  0x21   : > { %s889_s26 = smov 128   ;;  %s890_s27 = smov 8  }
  0x22   : > { %697 = dma.hbm_to_vmem [thread:$0]  (!%p982_p13), %s128_s29, 256, %s130_s3, %s118_s5, %s889_s26, %s889_s26, %s890_s27  }
  0x23   : > { %p1006_p2 = pnand %p664_p0, %p159_p1  ;;  %s148_s7 = scalar_lea.hbm %s1227_s1, %s678_s24 }
  0x24   : > { %s149_s8 = sshll.u32 %s148_s7, 4  ;;  %s143_s14 = scalar_lea.vmem [#allocation6], %s658_s25  ;;  %s150_s8 = int_to_ptr.hbm [resolvable:$true] %s149_s8 }
  0x25   : > { %s151_s16 = sshll.u32 %s143_s14, 4  ;;  %s140_s17 = scalar_lea.sflag [#allocation7], %s969_s23  ;;  %s152_s16 = int_to_ptr.vmem [resolvable:$true] %s151_s16 }
  0x26   : > { %s787_s19 = sshra.s32 %s150_s8, 4  ;;  %s794_s30 = scalar_lea.hbm %s1227_s1, 32  ;;  %s788_s19 = int_to_ptr.hbm [resolvable:$true] %s787_s19 }
  0x27   : > { %s789_s29 = scalar_lea.hbm %s788_s19, 16  ;;  %p795_p4 = scmp.lt.s32.totalorder %s788_s19, %s1227_s1 }
  0x28   : > { %p790_p9 = scmp.ne.s32.totalorder %s788_s19, %s789_s29  ;;  %p796_p7 = scmp.lt.s32.totalorder %s794_s30, %s789_s29 }
  0x2a   : > { %p792_p0 = pnand %p790_p9, %p761_p3  ;;  %p797_p5 = por %p796_p7, %p795_p4 }
  0x2c   : > { %p793_p1 = pneg %p792_p0 }
  0x2e   : > { %p798_p8 = pnand %p797_p5, %p793_p1 }
  0x30   : > { %801 = shalt.err (!%p798_p8)
}
  0x31   : > { %700 = dma.hbm_to_vmem [thread:$0]  (!%p982_p13), %s150_s8, 256, %s152_s16, %s140_s17, %s889_s26, %s889_s26, %s890_s27  }
  0x32   : > { %163 = sbr.rel (%p1006_p2) target bundleno = 670 (0x29e), region = 28  ;;  %s1032_s23 = sand.u32 (!%p1006_p2), 1, %s879_s10  }
  0x33   : > { %s665_s25 = sshll.u32 (!%p1006_p2), %s1032_s23, 4  ;;  %s166_s7 = scalar_lea.sflag (!%p1006_p2), [#allocation4], %s1032_s23 }
  0x34   : > { %s169_s14 = scalar_lea.vmem (!%p1006_p2), [#allocation3], %s665_s25 }
  0x37   : > { %862 = dma.done.wait (%p953_p6), %s166_s7, 256  }
  0x38   : > { %864 = vsyncadd (%p953_p6), %s166_s7, 4294967040  ;;  %s176_s4 = scalar_lea.sflag [#allocation7], %s1032_s23  ;;  %s1041_s26 = scalar_lea.vmem [#allocation6], %s665_s25 }
  0x39   : > { %866 = dma.done.wait (%p953_p6), %s176_s4, 256  }
  0x3a   : > { %868 = vsyncadd (%p953_p6), %s176_s4, 4294967040  ;;  %vm212_vm0 = vcmask 130048   ;;  %v891_v0 = vmov 0.0   ;;  %v1048_v1 = vld [vmem:[%s169_s14] sm:$0xff]  ;;  %s892_s27 = smov 127   ;;  %v1056_v2 = vld [vmem:[%s169_s14 + $0x8] sm:$0xff] }
  0x3b   : > { %215 = vst [vmem:[#allocation2 + $0x20] sm:$0xff] %v891_v0  ;;  %231 = vrot.lane.b32.xlu0 %v1048_v1, %s892_s27  ;;  %s893_s20 = smov 126   ;;  %s894_s28 = smov 1   ;;  %vm275_vm1 = vcmask 1046528   ;;  %vm265_vm2 = vcmask 7168   ;;  %vm309_vm3 = vcmask 1045504  }
  0x3c   : > { %210 = vst [vmem:[#allocation2] sm:$0xff] %v891_v0  ;;  %v321_v48 = vmul.f32 9.0, %v1048_v1  ;;  %vm326_vm4 = vcmask 1040384   ;;  %v322_v62 = vmul.f32 9.0, %v1056_v2  ;;  %s667_s8 = sshll.u32 %s1032_s23, 3  ;;  %s675_s17 = sshll.u32 %s931_s13, 3 }
  0x3d   : > { %223 = vst.msk [vmem:[#allocation2 + $0x20] sm:$0xff] %vm212_vm0, %v1048_v1  ;;  %s557_s30 = scalar_lea.hbm %s1228_s2, %s675_s17  ;;  %s205_s13 = scalar_lea.vmem [#allocation8], %s667_s8 }
  0x3e   : > { %211 = vst [vmem:[#allocation2 + $0x8] sm:$0xff] %v891_v0  ;;  %s559_s6 = sshll.u32 %s205_s13, 4  ;;  %s561_s25 = sshll.u32 %s557_s30, 4  ;;  %s560_s6 = int_to_ptr.vmem [resolvable:$true] %s559_s6  ;;  %s562_s25 = int_to_ptr.hbm [resolvable:$true] %s561_s25 }
  0x3f   : > { %217 = vst [vmem:[#allocation2 + $0x30] sm:$0xff] %v891_v0  ;;  %s547_s7 = scalar_lea.sflag [#allocation5], %s1032_s23  ;;  %s831_s14 = sshra.s32 %s562_s25, 4  ;;  %s832_s14 = int_to_ptr.hbm [resolvable:$true] %s831_s14 }
  0x40   : > { %218 = vst [vmem:[#allocation2 + $0x38] sm:$0xff] %v891_v0  ;;  %s833_s4 = scalar_lea.hbm %s832_s14, 8  ;;  %p838_p10 = scmp.lt.s32.totalorder %s832_s14, %s1228_s2 }
  0x41   : > { %221 = vst [vmem:[#allocation2 + $0x50] sm:$0xff] %v891_v0  ;;  %p834_p6 = scmp.ne.s32.totalorder %s832_s14, %s833_s4 }
  0x42   : > { %224 = vst.msk [vmem:[#allocation2 + $0x38] sm:$0xff] %vm212_vm0, %v1056_v2 }
  0x43   : > { %233 = vrot.lane.b32.xlu0 %v1056_v2, %s892_s27  ;;  %v346_v26 = vld [vmem:[#allocation2] sm:$0x80]  ;;  %p835_p13 = pnand %p834_p6, %p960_p11 }
  0x44   : > { %v226_v3 = vld [vmem:[#allocation2 + $0x20] sm:$0xff] }
  0x45   : > { %243 = vrot.lane.b32.xlu1 %v226_v3, %s893_s20  ;;  %v1081_v30 = vld [vmem:[#allocation2 + $0x8] sm:$0x80]  ;;  %p836_p3 = pneg %p835_p13 }
  0x46   : > { %v347_v24 = vld [vmem:[#allocation2 + $0x30] sm:$0x7f]  ;;  %v272_v33 = vld [vmem:[#allocation2 + $0x8] sm:$0x80] }
  0x48   : > { %v305_v46 = vld [vmem:[#allocation2 + $0x50] sm:$0x1] }
  0x49   : > { %v228_v4 = vld [vmem:[#allocation2 + $0x38] sm:$0xff]  ;;  %v313_v51 = vrot.slane %v305_v46, 2 }
  0x4d   : > { %245 = vrot.lane.b32.xlu1 %v228_v4, %s893_s20  ;;  %s837_s20 = scalar_lea.hbm %s1228_s2, 16 }
  0x4e   : > { %p839_p2 = scmp.lt.s32.totalorder %s837_s20, %s833_s4 }
  0x50   : > { %p840_p9 = por %p839_p2, %p838_p10 }
  0x52   : > { %p841_p0 = pnand %p840_p9, %p836_p3 }
  0xad   : > { %v232_v5 = vpop.permute.xlu0 %231 }
  0xae   : > { %v238_v10 = vadd.f32 %v232_v5, %v226_v3 }
  0xb5   : > { %v234_v8 = vpop.permute.xlu0 %233 }
  0xb6   : > { %v240_v9 = vadd.f32 %v234_v8, %v228_v4 }
  0xb7   : > { %v244_v6 = vpop.permute.xlu1 %243 }
  0xb8   : > { %v249_v7 = vadd.f32 %v244_v6, %v232_v5  ;;  %v250_v14 = vadd.f32 %v244_v6, %v238_v10 }
  0xba   : > { %257 = vrot.lane.b32.xlu2 %v249_v7, %s894_s28  ;;  %v276_v16 = vrot.slane %v249_v7, 1  ;;  %v277_v17 = vrot.slane %v250_v14, 1  ;;  %v1114_v7 = vld [vmem:[%s1041_s26] sm:$0xff] }
  0xbb   : > { %vm438_vm8 = vcmp.ge.f32.partialorder %v1114_v7, 0.0 }
  0xbf   : > { %v246_v11 = vpop.permute.xlu1 %245 }
  0xc0   : > { %v251_v12 = vadd.f32 %v246_v11, %v234_v8  ;;  %v252_v13 = vadd.f32 %v246_v11, %v240_v9  ;;  %v416_v8 = vand.u32 2147483647, %v1114_v7  ;;  %v1118_v11 = vld [vmem:[%s1041_s26 + $0x8] sm:$0xff] }
  0xc1   : > { %vm439_vm12 = vcmp.ge.f32.partialorder %v1118_v11, 0.0 }
  0xc2   : > { %263 = vrot.lane.b32.xlu1 %v252_v13, %s894_s28  ;;  %261 = vrot.lane.b32.xlu0 %v251_v12, %s894_s28  ;;  %v278_v15 = vrot.slane %v251_v12, 1  ;;  %v280_v19 = vrot.slane %v252_v13, 1  ;;  %v418_v9 = vsub.f32 0.0, %v416_v8  ;;  %v417_v12 = vand.u32 2147483647, %v1118_v11 }
  0xc3   : > { %259 = vrot.lane.b32.xlu2 %v250_v14, %s894_s28 }
  0xc4   : > { %v279_v18 = vsel %vm275_vm1, %v276_v16, %v278_v15  ;;  %v281_v20 = vsel %vm275_vm1, %v277_v17, %v280_v19  ;;  %v420_v10 = vmul.f32 1.442695, %v418_v9  ;;  %v419_v13 = vsub.f32 0.0, %v417_v12 }
  0xc6   : > { %745 = vpow2.f32 %v420_v10  ;;  %v422_v14 = vmul.f32 1.442695, %v419_v13 }
  0xc8   : > { %747 = vpow2.f32 %v422_v14 }
  0xca   : > { %286 = vrot.lane.b32.xlu1 %v279_v18, %s894_s28  ;;  %284 = vrot.lane.b32.xlu0 %v277_v17, %s894_s28 }
  0xcb   : > { %282 = vrot.lane.b32.xlu2 %v276_v16, %s894_s28 }
  0xd2   : > { %292 = vrot.lane.b32.xlu1 %v280_v19, %s894_s28  ;;  %290 = vrot.lane.b32.xlu0 %v278_v15, %s894_s28  ;;  %v746_v15 = vpop.eup %745 }
  0xd3   : > { %288 = vrot.lane.b32.xlu2 %v281_v20, %s894_s28  ;;  %v1121_v16 = vadd.f32 1.0, %v746_v15  ;;  %v748_v17 = vpop.eup %747 }
  0xd4   : > { %v1124_v18 = vadd.f32 1.0, %v748_v17 }
  0xd5   : > { %749 = vrcp.f32 %v1121_v16  ;;  %vm447_vm5 = vweird.f32 %v1121_v16 }
  0xd6   : > { %751 = vrcp.f32 %v1124_v18  ;;  %vm462_vm10 = vweird.f32 %v1124_v18 }
  0xd7   : > { %753 = vlog2.f32 %v1121_v16 }
  0xd8   : > { %755 = vlog2.f32 %v1124_v18 }
  0xda   : > { %385 = vrot.lane.b32.xlu0 %v347_v24, %s894_s28  ;;  %381 = vrot.lane.b32.xlu1 %v346_v26, %s894_s28  ;;  %v451_v26 = vand.u32 2147483647, %v1121_v16 }
  0xdb   : > { %363 = vrot.lane.b32.xlu2 %v891_v0, %s894_s28  ;;  %v750_v19 = vpop.eup %749 }
  0xdc   : > { %v443_v20 = vmul.f32 %v750_v19, %v1121_v16  ;;  %v752_v24 = vpop.eup %751  ;;  %vm448_vm6 = vweird.f32 %v750_v19  ;;  %vm452_vm9 = vcmp.eq.f32.partialorder %v451_v26, 8.507059e+37 }
  0xdd   : > { %vm449_vm7 = vmor %vm447_vm5, %vm448_vm6  ;;  %vm463_vm11 = vweird.f32 %v752_v24 }
  0xde   : > { %vm464_vm13 = vmor %vm462_vm10, %vm463_vm11 }
  0xe3   : > { %383 = vrot.lane.b32.xlu2 %v1081_v30, %s894_s28 }
  0xeb   : > { %367 = vrot.lane.b32.xlu2 %v891_v0, %s894_s28 }
 0x114   : > { %v258_v21 = vpop.permute.xlu2 %257 }
 0x11d   : > { %v260_v22 = vpop.permute.xlu2 %259 }
 0x11e   : > { %v266_v23 = vsel %vm265_vm2, %v258_v21, %v260_v22  ;;  %v444_v21 = vsub.f32 1.0, %v443_v20 }
 0x11f   : > { %270 = vst.msk [vmem:[#allocation2 + $0x20] sm:$0xff] %vm212_vm0, %v266_v23  ;;  %v453_v23 = vand.u32 2147483648, %v1121_v16  ;;  %v754_v16 = vpop.eup %753 }
 0x120   : > { %v445_v22 = vmul.f32 %v750_v19, %v444_v21 }
 0x125   : > { %v283_v25 = vpop.permute.xlu2 %282 }
 0x126   : > { %v303_v32 = vld [vmem:[#allocation2 + $0x20] sm:$0xfe] }
 0x127   : > { %v273_v37 = vld [vmem:[#allocation2 + $0x20] sm:$0xff]  ;;  %v310_v42 = vrot.slane %v303_v32, 2 }
 0x12d   : > { %v289_v31 = vpop.permute.xlu2 %288 }
 0x134   : > { %v264_v27 = vpop.permute.xlu1 %263  ;;  %v262_v28 = vpop.permute.xlu0 %261 }
 0x135   : > { %v267_v29 = vsel %vm265_vm2, %v262_v28, %v264_v27  ;;  %v458_v27 = vmul.f32 %v752_v24, %v1124_v18  ;;  %v454_v28 = vor.u32 1.1754944e-38, %v453_v23 }
 0x136   : > { %271 = vst.msk [vmem:[#allocation2 + $0x38] sm:$0xff] %vm212_vm0, %v267_v29 }
 0x137   : > { %v459_v29 = vsub.f32 1.0, %v458_v27  ;;  %v427_v27 = vmax.f32 %v1118_v11, 0.0 }
 0x139   : > { %v460_v32 = vmul.f32 %v752_v24, %v459_v29 }
 0x13c   : > { %v287_v34 = vpop.permute.xlu1 %286  ;;  %v285_v35 = vpop.permute.xlu0 %284 }
 0x13d   : > { %v304_v36 = vld [vmem:[#allocation2 + $0x38] sm:$0xff]  ;;  %v295_v38 = vsel %vm265_vm2, %v287_v34, %v289_v31  ;;  %v294_v39 = vsel %vm265_vm2, %v283_v25, %v285_v35  ;;  %v446_v25 = vadd.f32 %v750_v19, %v445_v22  ;;  %v468_v34 = vand.u32 2147483648, %v1124_v18 }
 0x13e   : > { %v311_v40 = vrot.slane %v304_v36, 2  ;;  %v301_v41 = vadd.f32 %v295_v38, %v273_v37  ;;  %v300_v43 = vadd.f32 %v294_v39, %v272_v33  ;;  %v274_v55 = vld [vmem:[#allocation2 + $0x38] sm:$0x7f]  ;;  %v440_v33 = vsel %vm438_vm8, 1.0, %v746_v15  ;;  %v364_v37 = vpop.permute.xlu2 %363 }
 0x13f   : > { %v450_v31 = vsel %vm449_vm7, %v750_v19, %v446_v25  ;;  %v461_v36 = vadd.f32 %v752_v24, %v460_v32  ;;  %v466_v38 = vand.u32 2147483647, %v1124_v18  ;;  %v469_v39 = vor.u32 1.1754944e-38, %v468_v34  ;;  %v756_v25 = vpop.eup %755 }
 0x140   : > { %v312_v44 = vsel %vm309_vm3, %v310_v42, %v311_v40  ;;  %v318_v45 = vadd.f32 %v310_v42, %v300_v43  ;;  %v314_v59 = vsel %vm309_vm3, %v311_v40, %v313_v51  ;;  %v455_v35 = vsel %vm452_vm9, %v454_v28, %v450_v31 }
 0x141   : > { %v319_v47 = vadd.f32 %v312_v44, %v301_v41  ;;  %v348_v40 = vlaneseq  ;;  %v441_v41 = vsel %vm439_vm12, 1.0, %v748_v17  ;;  %v465_v42 = vsel %vm464_vm13, %v752_v24, %v461_v36 }
 0x142   : > { %v327_v49 = vrot.slane %v318_v45, 7  ;;  %v456_v43 = vmul.f32 %v455_v35, %v440_v33  ;;  %vm467_vm14 = vcmp.eq.f32.partialorder %v466_v38, 8.507059e+37  ;;  %v426_v22 = vmax.f32 %v1114_v7, 0.0 }
 0x143   : > { %v328_v50 = vrot.slane %v319_v47, 7  ;;  %v470_v44 = vsel %vm467_vm14, %v469_v39, %v465_v42  ;;  %v352_v47 = vand.u32 127, %v348_v40  ;;  %v433_v18 = vmul.f32 0.6931472, %v754_v16 }
 0x144   : > { %v293_v52 = vpop.permute.xlu1 %292  ;;  %v291_v53 = vpop.permute.xlu0 %290  ;;  %v471_v45 = vmul.f32 %v470_v44, %v441_v41  ;;  %v498_v46 = vsel %vm212_vm0, %v456_v43, 0.0  ;;  %v435_v33 = vmul.f32 0.6931472, %v756_v25 }
 0x145   : > { %v329_v54 = vsel %vm326_vm4, %v327_v49, %v328_v50  ;;  %v296_v56 = vsel %vm265_vm2, %v291_v53, %v293_v52  ;;  %v357_v51 = vand.u32 1, %v352_v47 }
 0x146   : > { %v334_v57 = vsub.f32 %v321_v48, %v329_v54  ;;  %v302_v58 = vadd.f32 %v296_v56, %v274_v55  ;;  %v499_v48 = vsel %vm212_vm0, %v471_v45, 0.0  ;;  %v384_v53 = vpop.permute.xlu2 %383  ;;  %v1139_v54 = vshrl.u32 %v348_v40, 7 }
 0x147   : > { %v500_v49 = vadd.f32 %v499_v48, %v498_v46  ;;  %vm1141_vm15 = vcmp.eq.s32.totalorder %v357_v51, 0 }
 0x148   : > { %v1094_v60 = vmax.f32 %v334_v57, 0.0  ;;  %v320_v61 = vadd.f32 %v314_v59, %v302_v58  ;;  %v353_v58 = vand.u32 1, %v1139_v54  ;;  %vm533_vm6 = vcmp.eq.s32.totalorder %v1139_v54, 2 }
 0x149   : > { %vm539_vm7 = vcmp.eq.s32.totalorder %v1139_v54, 3 }
 0x14a   : > { %338 = vst.msk [vmem:[#allocation2 + $0x20] sm:$0xff] %vm212_vm0, %v1094_v60  ;;  %v330_v63 = vrot.slane %v320_v61, 7  ;;  %vm355_vm1 = vcmp.eq.s32.totalorder %v353_v58, 0 }
 0x14c   : > { %v331_v1 = vsel %vm326_vm4, %v328_v50, %v330_v63  ;;  %v386_v50 = vpop.permute.xlu0 %385  ;;  %v382_v52 = vpop.permute.xlu1 %381 }
 0x14d   : > { %v335_v3 = vsub.f32 %v322_v62, %v331_v1  ;;  %v389_v56 = vsel %vm265_vm2, %v382_v52, %v384_v53  ;;  %v350_v1 = vadd.s32 8, %v1139_v54 }
 0x14e   : > { %v393_v57 = vsel %vm1141_vm15, %v1081_v30, %v389_v56  ;;  %v368_v10 = vpop.permute.xlu2 %367 }
 0x14f   : > { %v1100_v4 = vmax.f32 %v335_v3, 0.0  ;;  %v399_v61 = vrot.slane %v393_v57, 7  ;;  %v354_v9 = vand.u32 1, %v350_v1 }
 0x151   : > { %339 = vst.msk [vmem:[#allocation2 + $0x38] sm:$0xff] %vm212_vm0, %v1100_v4  ;;  %v1104_v5 = vld [vmem:[#allocation2 + $0x20] sm:$0xff]  ;;  %vm356_vm5 = vcmp.eq.s32.totalorder %v354_v9, 0 }
 0x152   : > { %365 = vrot.lane.b32.xlu0 %v1104_v5, %s894_s28 }
 0x158   : > { %v1108_v6 = vld [vmem:[#allocation2 + $0x38] sm:$0x7f] }
 0x159   : > { %v343_v2 = vld [vmem:[#allocation2 + $0x38] sm:$0xff]  ;;  %387 = vrot.lane.b32.xlu1 %v1108_v6, %s894_s28 }
 0x15a   : > { %369 = vrot.lane.b32.xlu0 %v343_v2, %s894_s28 }
 0x184   : > { %501 = vadd.xlane.f32.xlu0 %v500_v49 }
 0x1c4   : > { %v366_v59 = vpop.permute.xlu0 %365 }
 0x1c5   : > { %v371_v62 = vsel %vm265_vm2, %v364_v37, %v366_v59 }
 0x1c6   : > { %v394_v63 = vsel %vm1141_vm15, %v1104_v5, %v371_v62  ;;  %v375_v2 = vsel %vm1141_vm15, %v1094_v60, %v371_v62 }
 0x1c7   : > { %v400_v3 = vrot.slane %v394_v63, 7 }
 0x1c9   : > { %v401_v30 = vsel %vm326_vm4, %v399_v61, %v400_v3 }
 0x1ca   : > { %v406_v8 = vsel %vm355_vm1, %v375_v2, %v401_v30 }
 0x1cb   : > { %v408_v12 = vmax.f32 %v1094_v60, %v406_v8  ;;  %v388_v13 = vpop.permute.xlu1 %387 }
 0x1cc   : > { %v390_v5 = vsel %vm265_vm2, %v386_v50, %v388_v13  ;;  %v370_v14 = vpop.permute.xlu0 %369 }
 0x1cd   : > { %v395_v15 = vsel %vm1141_vm15, %v1108_v6, %v390_v5  ;;  %v372_v17 = vsel %vm265_vm2, %v368_v10, %v370_v14  ;;  %vm410_vm3 = vcmp.gt.f32.partialorder %v408_v12, 0.1 }
 0x1ce   : > { %v402_v19 = vrot.slane %v395_v15, 7  ;;  %v668_v20 = vsel %vm410_vm3, 1.0, %v891_v0  ;;  %v376_v21 = vsel %vm1141_vm15, %v1100_v4, %v372_v17 }
 0x1cf   : > { %v428_v6 = vmul.f32 %v668_v20, %v1114_v7  ;;  %v484_v26 = vmul.f32 %v668_v20, %v456_v43 }
 0x1d0   : > { %v403_v60 = vsel %vm326_vm4, %v400_v3, %v402_v19  ;;  %vm527_vm4 = vcmp.eq.s32.totalorder %v1139_v54, 1 }
 0x1d1   : > { %v407_v23 = vsel %vm356_vm5, %v376_v21, %v403_v60  ;;  %v430_v28 = vsub.f32 %v426_v22, %v428_v6  ;;  %v486_v34 = vsel %vm212_vm0, %v484_v26, 0.0  ;;  %v671_v14 = vsel %vm527_vm4, 1.0, %v891_v0 }
 0x1d2   : > { %v409_v24 = vmax.f32 %v1100_v4, %v407_v23  ;;  %v673_v21 = vsel %vm539_vm7, 1.0, %v891_v0 }
 0x1d3   : > { %v436_v36 = vadd.f32 %v433_v18, %v430_v28 }
 0x1d4   : > { %vm411_vm2 = vcmp.gt.f32.partialorder %v409_v24, 0.1 }
 0x1d5   : > { %v669_v29 = vsel %vm411_vm2, 1.0, %v891_v0  ;;  %v472_v38 = vsel %vm212_vm0, %v436_v36, 0.0 }
 0x1d6   : > { %v485_v31 = vmul.f32 %v669_v29, %v471_v45  ;;  %v429_v32 = vmul.f32 %v669_v29, %v1118_v11  ;;  %v511_v41 = vsel %vm212_vm0, %v669_v29, 0.0  ;;  %v510_v11 = vsel %vm212_vm0, %v668_v20, 0.0 }
 0x1d7   : > { %v512_v42 = vadd.f32 %v511_v41, %v510_v11  ;;  %v672_v20 = vsel %vm533_vm6, 1.0, %v891_v0 }
 0x1d8   : > { %v487_v7 = vsel %vm212_vm0, %v485_v31, 0.0  ;;  %v431_v35 = vsub.f32 %v427_v27, %v429_v32 }
 0x1d9   : > { %v488_v4 = vadd.f32 %v487_v7, %v486_v34 }
 0x1da   : > { %v437_v37 = vadd.f32 %v435_v33, %v431_v35 }
 0x1db   : > { %489 = vadd.xlane.f32.xlu2 %v488_v4 }
 0x1dc   : > { %v473_v39 = vsel %vm212_vm0, %v437_v37, 0.0  ;;  %vm522_vm0 = vcmp.eq.s32.totalorder %v1139_v54, 0 }
 0x1dd   : > { %v474_v40 = vadd.f32 %v473_v39, %v472_v38  ;;  %v670_v5 = vsel %vm522_vm0, 1.0, %v891_v0 }
 0x1df   : > { %475 = vadd.xlane.f32.xlu1 %v474_v40 }
 0x1e3   : > { %513 = vadd.xlane.f32.xlu2 %v512_v42 }
 0x1f7   : > { %v502_v43 = vpop.xlane.xlu0 %501 }
 0x1f8   : > { %v503_v44 = vrot.slane %v502_v43, 4 }
 0x1fa   : > { %v504_v46 = vadd.f32 %v503_v44, %v502_v43 }
 0x1fc   : > { %v505_v50 = vrot.slane %v504_v46, 2 }
 0x1fe   : > { %v506_v57 = vadd.f32 %v505_v50, %v504_v46 }
 0x200   : > { %v507_v2 = vrot.slane %v506_v57, 1 }
 0x202   : > { %v508_v10 = vadd.f32 %v507_v2, %v506_v57 }
 0x24e   : > { %v490_v45 = vpop.xlane.xlu2 %489 }
 0x24f   : > { %v491_v47 = vrot.slane %v490_v45, 4 }
 0x251   : > { %v492_v48 = vadd.f32 %v491_v47, %v490_v45 }
 0x252   : > { %v476_v49 = vpop.xlane.xlu1 %475 }
 0x253   : > { %v493_v51 = vrot.slane %v492_v48, 2  ;;  %v477_v52 = vrot.slane %v476_v49, 4 }
 0x255   : > { %v478_v53 = vadd.f32 %v477_v52, %v476_v49  ;;  %v494_v56 = vadd.f32 %v493_v51, %v492_v48 }
 0x256   : > { %v514_v55 = vpop.xlane.xlu2 %513 }
 0x257   : > { %v479_v58 = vrot.slane %v478_v53, 2  ;;  %v515_v59 = vrot.slane %v514_v55, 4  ;;  %v495_v63 = vrot.slane %v494_v56, 1 }
 0x259   : > { %v516_v61 = vadd.f32 %v515_v59, %v514_v55  ;;  %v480_v62 = vadd.f32 %v479_v58, %v478_v53  ;;  %v496_v9 = vadd.f32 %v495_v63, %v494_v56 }
 0x25b   : > { %v517_v1 = vrot.slane %v516_v61, 2  ;;  %v481_v3 = vrot.slane %v480_v62, 1 }
 0x25d   : > { %v518_v30 = vadd.f32 %v517_v1, %v516_v61  ;;  %v482_v8 = vadd.f32 %v481_v3, %v480_v62 }
 0x25f   : > { %680 = vpush %v482_v8  ;;  %v519_v12 = vrot.slane %v518_v30, 1 }
 0x260   : > { %682 = vpush %v496_v9 }
 0x261   : > { %684 = vpush %v508_v10  ;;  %v520_v13 = vadd.f32 %v519_v12, %v518_v30 }
 0x263   : > { %686 = vpush %v520_v13 }
 0x290   : > { %s681_s16 = spop %680 }
 0x291   : > { %v525_v15 = vstv %s681_s16  ;;  %s683_s19 = spop %682 }
 0x292   : > { %v526_v17 = vmul.f32 %v670_v5, %v525_v15  ;;  %v530_v19 = vstv %s683_s19  ;;  %s685_s29 = spop %684 }
 0x293   : > { %v531_v16 = vmul.f32 %v671_v14, %v530_v19  ;;  %v536_v60 = vstv %s685_s29 }
 0x294   : > { %s687_s24 = spop %686  ;;  %v537_v54 = vmul.f32 %v672_v20, %v536_v60 }
 0x295   : > { %v532_v22 = vadd.f32 %v531_v16, %v526_v17  ;;  %v542_v6 = vstv %s687_s24 }
 0x296   : > { %v543_v23 = vmul.f32 %v673_v21, %v542_v6 }
 0x297   : > { %v538_v24 = vadd.f32 %v537_v54, %v532_v22 }
 0x299   : > { %v544_v25 = vadd.f32 %v543_v23, %v538_v24 }
 0x29b   : > { %545 = vst [vmem:[%s205_s13] sm:$0xff] %v544_v25 }
 0x29c   : > { %844 = shalt.err (!%p841_p0)
}
 0x29d   : > { %692 = dma.vmem_to_hbm [thread:$0]  (%p960_p11), %s560_s6, 128, %s562_s25, %s547_s7  }
 0x29e PF: > { %s573_s23 = sand.u32 1, %s875_s9   ;;  %p1237_p1 = scmp.ge.s32.totalorder %s887_s12, 2 }
 0x29f   : > { %s574_s16 = scalar_lea.sflag [#allocation5], %s573_s23 }
 0x2a0   : > { %p702_p4 = pnand %p1237_p1, %p964_p12 }
 0x2a2   : > { %p703_p7 = pneg %p702_p4 }
 0x2a4   : > { %870 = dma.done.wait (%p703_p7), %s574_s16, 128  }
 0x2a5   : > { %872 = vsyncadd (%p703_p7), %s574_s16, 4294967168  ;;  %p18_p5 = scmp.ge.s32.totalorder %s935_s15, 4   ;;  %s1238_s9 = smov %s879_s10 }
 0x2a6   : > { %s1239_s10 = smov %s883_s11  ;;  %s1240_s11 = smov %s947_s18 }
 0x2a7   : > { %s1241_s12 = smov %s935_s15  ;;  %20 = sbr.rel (!%p18_p5) target bundleno = 7 (0x7), region = 86 }
 0x2ac   :  { %580 = vsyncpa [#allocation4], 1 }
 0x2ad   :  { %582 = vsyncpa [#allocation4 + $0x1], 1 }
 0x2ae   :  { %583 = vsyncpa [#allocation7], 1 }
 0x2af   :  { %585 = vsyncpa [#allocation7 + $0x1], 1 }
 0x2b0   :  { %586 = vsyncpa [#allocation5], 1 }
 0x2b1   :  { %588 = vsyncpa [#allocation5 + $0x1], 1 }

</bundles_post_ra>
